<compile_context>
chip_gen: v7x
topology: tpu7x:2x2x1
jax: 0.10.0
libtpu: 0.0.40
codegen_flags: <defaults>
</compile_context>

<pallas_src>
import jax
import jax.numpy as jnp
from jax.experimental import pallas as pl
from jax.experimental.pallas import tpu as pltpu

NEG_SLOPE = 0.01   # F.leaky_relu default negative slope
K_PAD = 128        # pad the 12-wide input feature dim to one full lane group
OUT_PAD = 128      # pad the 12-wide output dim to one full lane group


def _leaky_relu(h):
    # max(h, a*h) == leaky_relu(h) for 0 < a < 1 (one mul + one max on the VPU).
    return jnp.maximum(h, NEG_SLOPE * h)


def _mlp_kernel(x1_ref,
                w1_ref, b1_ref,
                w2_ref, b2_ref,
                w3_ref, b3_ref,
                o_ref):
    # --- layer 1: Linear(12->256) with BN folded in; leaky_relu in f32 ---
    h = jnp.dot(x1_ref[...].astype(jnp.bfloat16), w1_ref[...],
                preferred_element_type=jnp.float32)
    h = _leaky_relu(h + b1_ref[...])

    # --- layer 2: Linear(256->1024) with BN folded in (dominant matmul, bf16) ---
    h = jnp.dot(h.astype(jnp.bfloat16), w2_ref[...],
                preferred_element_type=jnp.float32)
    h = _leaky_relu(h + b2_ref[...])
    # dropout2: identity in eval mode

    # --- layer 3: Linear(1024->12), output lane-padded to 128 (dense vst) ---
    o_ref[...] = jnp.dot(h.astype(jnp.bfloat16), w3_ref[...],
                         preferred_element_type=jnp.float32) + b3_ref[...]


def net_without_row_forward(x, x1, prepared, *, block_batch=512):
    """x is accepted (to mirror the PyTorch signature) but unused by forward."""
    del x
    B = x1.shape[0]
    w1, b1 = prepared["w1"], prepared["b1"]
    w2, b2 = prepared["w2"], prepared["b2"]
    w3, b3 = prepared["w3"], prepared["b3"]

    # Batch tile: multiple of 8 sublanes, clamped to the (rounded-up) batch.
    b_rounded = ((B + 7) // 8) * 8
    tb = min(block_batch, b_rounded)
    b_pad = ((b_rounded + tb - 1) // tb) * tb
    grid = (b_pad // tb,)

    # Zero-pad batch and the 12-wide K dim to 128 lanes (padded W1 rows are 0,
    # so padded lanes contribute nothing).
    x1p = jnp.zeros((b_pad, K_PAD), jnp.float32).at[:B, :12].set(
        x1.astype(jnp.float32))

    def resident(arr):
        nd = arr.ndim
        return pl.BlockSpec(arr.shape, lambda i, _nd=nd: (0,) * _nd)

    flops = 2 * B * (12 * 256 + 256 * 1024 + 1024 * 12)
    bytes_accessed = (x1p.size * 4
                      + w1.size * 2 + w2.size * 2 + w3.size * 2
                      + b1.size * 4 + b2.size * 4 + b3.size * 4
                      + b_pad * OUT_PAD * 4)

    out = pl.pallas_call(
        _mlp_kernel,
        out_shape=jax.ShapeDtypeStruct((b_pad, OUT_PAD), jnp.float32),
        grid=grid,
        in_specs=[
            pl.BlockSpec((tb, K_PAD), lambda i: (i, 0)),   # x1 batch tile
            resident(w1), resident(b1),                    # resident weights/biases
            resident(w2), resident(b2),
            resident(w3), resident(b3),
        ],
        out_specs=pl.BlockSpec((tb, OUT_PAD), lambda i: (i, 0)),
        compiler_params=pltpu.CompilerParams(
            dimension_semantics=("parallel",),            # megacore on v7x
            vmem_limit_bytes=32 * 1024 * 1024,
        ),
        cost_estimate=pl.CostEstimate(
            flops=flops, transcendentals=0, bytes_accessed=bytes_accessed),
    )(x1p, w1, b1, w2, b2, w3, b3)

    return out[:B, :12]


def _xavier_uniform(key, fan_in, fan_out):
    # torch.nn.init.xavier_uniform_ on weight of shape (out, in); stored as (in, out).
    limit = (6.0 / (fan_in + fan_out)) ** 0.5
    return jax.random.uniform(key, (fan_in, fan_out), jnp.float32, -limit, limit)


def make_params(key, eps=1e-5):
    """Raw (unfolded) params mirroring the PyTorch module in eval mode."""
    ks = jax.random.split(key, 12)

    w1 = _xavier_uniform(ks[0], 12, 256)
    b1 = jax.random.uniform(ks[1], (1, 256), jnp.float32, -0.05, 0.05)
    w2 = _xavier_uniform(ks[2], 256, 1024)
    b2 = jax.random.uniform(ks[3], (1, 1024), jnp.float32, -0.05, 0.05)
    w3 = _xavier_uniform(ks[4], 1024, 12)
    b3 = jax.random.uniform(ks[5], (1, 12), jnp.float32, -0.05, 0.05)

    # Synthetic BatchNorm affine params + running stats, eval-mode fold:
    #   y = (z - mean)/sqrt(var+eps)*gamma + beta == z*s + t
    def bn_fold(kg, kb, km, kv, n):
        gamma = 1.0 + 0.1 * jax.random.normal(kg, (1, n), jnp.float32)
        beta = 0.1 * jax.random.normal(kb, (1, n), jnp.float32)
        mean = 0.1 * jax.random.normal(km, (1, n), jnp.float32)
        var = 1.0 + 0.1 * jax.random.uniform(kv, (1, n), jnp.float32)
        s = gamma / jnp.sqrt(var + eps)
        t = beta - mean * s
        return s, t

    s1, t1 = bn_fold(ks[6], ks[7], ks[8], ks[9], 256)
    s2, t2 = bn_fold(ks[10], ks[11], ks[8], ks[9], 1024)

    return dict(w1=w1, b1=b1, s1=s1, t1=t1,
                w2=w2, b2=b2, s2=s2, t2=t2,
                w3=w3, b3=b3)


def prepare_params(raw):
    """Fold eval-mode BN into the linears, lane-pad K/out to 128, cast weights to bf16."""
    w1 = raw["w1"] * raw["s1"]                     # (12, 256) * (1, 256)
    b1 = raw["b1"] * raw["s1"] + raw["t1"]
    w2 = raw["w2"] * raw["s2"]                     # (256, 1024) * (1, 1024)
    b2 = raw["b2"] * raw["s2"] + raw["t2"]
    w3, b3 = raw["w3"], raw["b3"]

    w1p = jnp.zeros((K_PAD, 256), jnp.float32).at[:12, :].set(w1)
    w3p = jnp.zeros((1024, OUT_PAD), jnp.float32).at[:, :12].set(w3)
    b3p = jnp.zeros((1, OUT_PAD), jnp.float32).at[:, :12].set(b3)

    return dict(
        w1=w1p.astype(jnp.bfloat16), b1=b1.astype(jnp.float32),
        w2=w2.astype(jnp.bfloat16), b2=b2.astype(jnp.float32),
        w3=w3p.astype(jnp.bfloat16), b3=b3p.astype(jnp.float32),
    )


def _reference_forward(x1, raw):
    """Pure-JAX f32 reference (eval-mode BN / dropout) for validation."""
    h = x1 @ raw["w1"] + raw["b1"]
    h = h * raw["s1"] + raw["t1"]
    h = jnp.where(h > 0, h, NEG_SLOPE * h)
    h = h @ raw["w2"] + raw["b2"]
    h = h * raw["s2"] + raw["t2"]
    h = jnp.where(h > 0, h, NEG_SLOPE * h)
    return h @ raw["w3"] + raw["b3"]


if __name__ == "__main__":
    key = jax.random.PRNGKey(0)
    k_params, k_x, k_x1 = jax.random.split(key, 3)

    raw_params = make_params(k_params)
    prepared = prepare_params(raw_params)

    B = 8
    x = jax.random.normal(k_x, (B, 4), jnp.float32)     # unused by forward (as in PyTorch)
    x1 = jax.random.normal(k_x1, (B, 12), jnp.float32)  # heuristic features

    out = net_without_row_forward(x, x1, prepared)
    out = jax.block_until_ready(out)

    assert out.shape == (B, 12) and out.dtype == jnp.float32

    # Sanity check vs. pure-JAX f32 reference (loose tolerance for bf16 matmuls).
    ref = _reference_forward(x1, raw_params)
    assert jnp.max(jnp.abs(out - ref)) < 1e-1, float(jnp.max(jnp.abs(out - ref)))

    print("KERNEL_OK")
</pallas_src>

<mosaic_0001>
module attributes {stable_mosaic.version = 11 : i64} {
  func.func @_mlp_kernel(%arg0: i32, %arg1: memref<8x128xf32, #tpu.memory_space<vmem>>, %arg2: memref<128x256xbf16, #tpu.memory_space<vmem>>, %arg3: memref<1x256xf32, #tpu.memory_space<vmem>>, %arg4: memref<256x1024xbf16, #tpu.memory_space<vmem>>, %arg5: memref<1x1024xf32, #tpu.memory_space<vmem>>, %arg6: memref<1024x128xbf16, #tpu.memory_space<vmem>>, %arg7: memref<1x128xf32, #tpu.memory_space<vmem>>, %arg8: memref<8x128xf32, #tpu.memory_space<vmem>>) attributes {dimension_semantics = [#tpu.dimension_semantics<parallel>], iteration_bounds = array<i64: 1>, scalar_prefetch = 0 : i64, scratch_operands = 0 : i64, tpu.core_type = #tpu.core_type<tc>, window_params = [{transform_indices = @transform_0, window_bounds = array<i64: 8, 128>}, {pipeline_mode = #tpu.pipeline_mode<synchronous>, transform_indices = @transform_1, window_bounds = array<i64: 128, 256>}, {pipeline_mode = #tpu.pipeline_mode<synchronous>, transform_indices = @transform_2, window_bounds = array<i64: 1, 256>}, {pipeline_mode = #tpu.pipeline_mode<synchronous>, transform_indices = @transform_3, window_bounds = array<i64: 256, 1024>}, {pipeline_mode = #tpu.pipeline_mode<synchronous>, transform_indices = @transform_4, window_bounds = array<i64: 1, 1024>}, {pipeline_mode = #tpu.pipeline_mode<synchronous>, transform_indices = @transform_5, window_bounds = array<i64: 1024, 128>}, {pipeline_mode = #tpu.pipeline_mode<synchronous>, transform_indices = @transform_6, window_bounds = array<i64: 1, 128>}, {transform_indices = @transform_7, window_bounds = array<i64: 8, 128>}]} {
    %c0 = arith.constant 0 : index
    %c0_0 = arith.constant 0 : index
    %0 = vector.load %arg1[%c0, %c0_0] : memref<8x128xf32, #tpu.memory_space<vmem>>, vector<8x128xf32>
    %1 = arith.truncf %0 : vector<8x128xf32> to vector<8x128xbf16>
    %c0_1 = arith.constant 0 : index
    %c0_2 = arith.constant 0 : index
    %2 = vector.load %arg2[%c0_1, %c0_2] : memref<128x256xbf16, #tpu.memory_space<vmem>>, vector<128x256xbf16>
    %cst = arith.constant dense<0.000000e+00> : vector<8x256xf32>
    %3 = tpu.matmul %1, %2, %cst {dimension_numbers = #tpu.dot_dimension_numbers<[1], [0], [0], [1], [0, 0, 1, 1], [], []>} : vector<8x128xbf16>, vector<128x256xbf16>, vector<8x256xf32> -> vector<8x256xf32>
    %c0_3 = arith.constant 0 : index
    %c0_4 = arith.constant 0 : index
    %4 = vector.load %arg3[%c0_3, %c0_4] : memref<1x256xf32, #tpu.memory_space<vmem>>, vector<1x256xf32>
    %5 = vector.broadcast %4 : vector<1x256xf32> to vector<8x256xf32>
    %6 = arith.addf %3, %5 : vector<8x256xf32>
    %cst_5 = arith.constant 0.00999999977 : f32
    %7 = vector.broadcast %cst_5 : f32 to vector<8x256xf32>
    %8 = arith.mulf %7, %6 : vector<8x256xf32>
    %9 = arith.maximumf %6, %8 : vector<8x256xf32>
    %10 = arith.truncf %9 : vector<8x256xf32> to vector<8x256xbf16>
    %c0_6 = arith.constant 0 : index
    %c0_7 = arith.constant 0 : index
    %11 = vector.load %arg4[%c0_6, %c0_7] : memref<256x1024xbf16, #tpu.memory_space<vmem>>, vector<256x1024xbf16>
    %cst_8 = arith.constant dense<0.000000e+00> : vector<8x1024xf32>
    %12 = tpu.matmul %10, %11, %cst_8 {dimension_numbers = #tpu.dot_dimension_numbers<[1], [0], [0], [1], [0, 0, 1, 1], [], []>} : vector<8x256xbf16>, vector<256x1024xbf16>, vector<8x1024xf32> -> vector<8x1024xf32>
    %c0_9 = arith.constant 0 : index
    %c0_10 = arith.constant 0 : index
    %13 = vector.load %arg5[%c0_9, %c0_10] : memref<1x1024xf32, #tpu.memory_space<vmem>>, vector<1x1024xf32>
    %14 = vector.broadcast %13 : vector<1x1024xf32> to vector<8x1024xf32>
    %15 = arith.addf %12, %14 : vector<8x1024xf32>
    %cst_11 = arith.constant 0.00999999977 : f32
    %16 = vector.broadcast %cst_11 : f32 to vector<8x1024xf32>
    %17 = arith.mulf %16, %15 : vector<8x1024xf32>
    %18 = arith.maximumf %15, %17 : vector<8x1024xf32>
    %19 = arith.truncf %18 : vector<8x1024xf32> to vector<8x1024xbf16>
    %c0_12 = arith.constant 0 : index
    %c0_13 = arith.constant 0 : index
    %20 = vector.load %arg6[%c0_12, %c0_13] : memref<1024x128xbf16, #tpu.memory_space<vmem>>, vector<1024x128xbf16>
    %cst_14 = arith.constant dense<0.000000e+00> : vector<8x128xf32>
    %21 = tpu.matmul %19, %20, %cst_14 {dimension_numbers = #tpu.dot_dimension_numbers<[1], [0], [0], [1], [0, 0, 1, 1], [], []>} : vector<8x1024xbf16>, vector<1024x128xbf16>, vector<8x128xf32> -> vector<8x128xf32>
    %c0_15 = arith.constant 0 : index
    %c0_16 = arith.constant 0 : index
    %22 = vector.load %arg7[%c0_15, %c0_16] : memref<1x128xf32, #tpu.memory_space<vmem>>, vector<1x128xf32>
    %23 = vector.broadcast %22 : vector<1x128xf32> to vector<8x128xf32>
    %24 = arith.addf %21, %23 : vector<8x128xf32>
    %c0_17 = arith.constant 0 : index
    %c0_18 = arith.constant 0 : index
    %25 = vector.load %arg8[%c0_17, %c0_18] : memref<8x128xf32, #tpu.memory_space<vmem>>, vector<8x128xf32>
    tpu.vector_store %arg8[%c0_17, %c0_18], %24 {strides = array<i32>} : memref<8x128xf32, #tpu.memory_space<vmem>>, vector<8x128xf32>,
    return
  }
  func.func @transform_0(%arg0: i32) -> (i32, i32) {
    %c0_i32 = arith.constant 0 : i32
    %c0_i32_0 = arith.constant 0 : i32
    return %arg0, %c0_i32 : i32, i32
  }
  func.func @transform_1(%arg0: i32) -> (i32, i32) {
    %c0_i32 = arith.constant 0 : i32
    %c0_i32_0 = arith.constant 0 : i32
    %c0_i32_1 = arith.constant 0 : i32
    return %c0_i32, %c0_i32_0 : i32, i32
  }
  func.func @transform_2(%arg0: i32) -> (i32, i32) {
    %c0_i32 = arith.constant 0 : i32
    %c0_i32_0 = arith.constant 0 : i32
    %c0_i32_1 = arith.constant 0 : i32
    return %c0_i32, %c0_i32_0 : i32, i32
  }
  func.func @transform_3(%arg0: i32) -> (i32, i32) {
    %c0_i32 = arith.constant 0 : i32
    %c0_i32_0 = arith.constant 0 : i32
    %c0_i32_1 = arith.constant 0 : i32
    return %c0_i32, %c0_i32_0 : i32, i32
  }
  func.func @transform_4(%arg0: i32) -> (i32, i32) {
    %c0_i32 = arith.constant 0 : i32
    %c0_i32_0 = arith.constant 0 : i32
    %c0_i32_1 = arith.constant 0 : i32
    return %c0_i32, %c0_i32_0 : i32, i32
  }
  func.func @transform_5(%arg0: i32) -> (i32, i32) {
    %c0_i32 = arith.constant 0 : i32
    %c0_i32_0 = arith.constant 0 : i32
    %c0_i32_1 = arith.constant 0 : i32
    return %c0_i32, %c0_i32_0 : i32, i32
  }
  func.func @transform_6(%arg0: i32) -> (i32, i32) {
    %c0_i32 = arith.constant 0 : i32
    %c0_i32_0 = arith.constant 0 : i32
    %c0_i32_1 = arith.constant 0 : i32
    return %c0_i32, %c0_i32_0 : i32, i32
  }
  func.func @transform_7(%arg0: i32) -> (i32, i32) {
    %c0_i32 = arith.constant 0 : i32
    %c0_i32_0 = arith.constant 0 : i32
    return %arg0, %c0_i32 : i32, i32
  }
}

</mosaic_0001>

<bundles_post_ra>
// kernel: tpu_custom_call.1
= control target key start
LH: loop header
LB: loop body
LE: loop exit
PB: predicated region body
PF: predicated region fallthrough
CT: control target
= control target key end

     0   :  { %12 = vsyncpa [#allocation3], 0  ;;  %s2603_s0 = inlined_call_operand.hbm [shape: f32[8,128], index: 0, kind: input, shape index: {}]   ;;  %s2604_s1 = inlined_call_operand.hbm [shape: bf16[128,256], index: 1, kind: input, shape index: {}]   ;;  %s2605_s2 = inlined_call_operand.vmem [shape: f32[1,256], index: 2, kind: input, shape index: {}]   ;;  %s2606_s3 = inlined_call_operand.hbm [shape: bf16[256,1024], index: 3, kind: input, shape index: {}]   ;;  %s2607_s4 = inlined_call_operand.vmem [shape: f32[1,1024], index: 4, kind: input, shape index: {}]   ;;  %s2608_s5 = inlined_call_operand.hbm [shape: bf16[1024,128], index: 5, kind: input, shape index: {}]   ;;  %s2609_s6 = inlined_call_operand.vmem [shape: f32[1,128], index: 6, kind: input, shape index: {}]   ;;  %s2610_s7 = inlined_call_operand.hbm [shape: f32[8,128], index: 7, kind: output, shape index: {}]  }
   0x1   :  { %13 = vsyncpa [#allocation6], 0 }
   0x2   :  { %14 = vsyncpa [#allocation9], 0 }
   0x3   :  { %15 = vsyncpa [#allocation4], 0  ;;  %s2448_s24 = smov [#allocation5]   ;;  %s2330_s28 = scalar_lea.hbm %s2604_s1, 2048 }
   0x4   :  { %s31_s25 = sshll.u32 %s2448_s24, 4  ;;  %p2331_p0 = scmp.ne.s32.totalorder %s2604_s1, %s2330_s28  ;;  %s32_s25 = int_to_ptr.vmem [resolvable:$true] %s31_s25 }
   0x5   :  { %p2334_p1 = scmp.lt.u32.totalorder %s2330_s28, %s2604_s1 }
   0x7   :  { %p2336_p2 = pnand %p2334_p1, %p2331_p0 }
   0x9   :  { %2339 = shalt.err (!%p2336_p2)
}
   0xa   :  { %s2340_s10 = scalar_lea.vmem %s32_s25, 2048  ;;  %p2345_p4 = scmp.lt.s32.totalorder %s32_s25, %s32_s25 }
   0xb   :  { %p2341_p3 = scmp.ne.s32.totalorder %s32_s25, %s2340_s10  ;;  %p2346_p5 = scmp.lt.s32.totalorder %s2340_s10, %s2340_s10 }
   0xd   :  { %p2347_p6 = por %p2346_p5, %p2345_p4 }
   0xf   :  { %p2348_p7 = pnand %p2347_p6, %p2341_p3 }
  0x11   :  { %2351 = shalt.err (!%p2348_p7)
}
  0x12   :  { %s2449_s11 = smov 128   ;;  %s2450_s12 = smov 8  }
  0x13   :  { %37 = dma.hbm_to_vmem [thread:$0]  %s2604_s1, 2048, %s32_s25, [#allocation6], %s2449_s11, %s2449_s11, %s2450_s12  }
  0x14   :  { %s2451_s15 = smov [#allocation2]   ;;  %s2452_s17 = smov [#allocation7]  }
  0x15   :  { %s22_s16 = sshll.u32 %s2451_s15, 4  ;;  %s45_s18 = sshll.u32 %s2452_s17, 4  ;;  %s23_s16 = int_to_ptr.vmem [resolvable:$true] %s22_s16  ;;  %s46_s18 = int_to_ptr.vmem [resolvable:$true] %s45_s18 }
  0x16   :  { %s2352_s21 = scalar_lea.hbm %s2603_s0, 128 }
  0x17   :  { %p2353_p8 = scmp.ne.s32.totalorder %s2603_s0, %s2352_s21  ;;  %p2356_p9 = scmp.lt.u32.totalorder %s2352_s21, %s2603_s0 }
  0x19   :  { %p2358_p10 = pnand %p2356_p9, %p2353_p8 }
  0x1b   :  { %2361 = shalt.err (!%p2358_p10)
}
  0x1c   :  { %s2362_s1 = scalar_lea.vmem %s23_s16, 128  ;;  %p2367_p12 = scmp.lt.s32.totalorder %s23_s16, %s23_s16 }
  0x1d   :  { %p2363_p11 = scmp.ne.s32.totalorder %s23_s16, %s2362_s1  ;;  %p2368_p13 = scmp.lt.s32.totalorder %s2362_s1, %s2362_s1 }
  0x1f   :  { %p2369_p0 = por %p2368_p13, %p2367_p12 }
  0x21   :  { %p2370_p1 = pnand %p2369_p0, %p2363_p11 }
  0x23   :  { %2373 = shalt.err (!%p2370_p1)
}
  0x24   :  { %25 = dma.hbm_to_vmem [thread:$0]  %s2603_s0, 128, %s23_s16, [#allocation3]  }
  0x25   :  { %s2374_s30 = scalar_lea.hbm %s2606_s3, 16384 }
  0x26   :  { %p2375_p2 = scmp.ne.s32.totalorder %s2606_s3, %s2374_s30  ;;  %p2378_p3 = scmp.lt.u32.totalorder %s2374_s30, %s2606_s3 }
  0x28   :  { %p2380_p4 = pnand %p2378_p3, %p2375_p2 }
  0x2a   :  { %2383 = shalt.err (!%p2380_p4)
}
  0x2b   :  { %s2384_s12 = scalar_lea.vmem %s46_s18, 16384  ;;  %p2389_p6 = scmp.lt.s32.totalorder %s46_s18, %s46_s18 }
  0x2c   :  { %p2385_p5 = scmp.ne.s32.totalorder %s46_s18, %s2384_s12  ;;  %p2390_p7 = scmp.lt.s32.totalorder %s2384_s12, %s2384_s12 }
  0x2e   :  { %p2391_p8 = por %p2390_p7, %p2389_p6 }
  0x30   :  { %p2392_p9 = pnand %p2391_p8, %p2385_p5 }
  0x32   :  { %2395 = shalt.err (!%p2392_p9)
}
  0x33   :  { %s2453_s0 = smov 512   ;;  %s2454_s13 = smov 32  }
  0x34   :  { %51 = dma.hbm_to_vmem [thread:$0]  %s2606_s3, 16384, %s46_s18, [#allocation6], %s2453_s0, %s2453_s0, %s2454_s13  }
  0x35   :  { %s2455_s16 = smov [#allocation8]   ;;  %s2396_s21 = scalar_lea.hbm %s2608_s5, 8192 }
  0x36   :  { %s59_s17 = sshll.u32 %s2455_s16, 4  ;;  %p2397_p10 = scmp.ne.s32.totalorder %s2608_s5, %s2396_s21  ;;  %s60_s17 = int_to_ptr.vmem [resolvable:$true] %s59_s17 }
  0x37   :  { %p2400_p11 = scmp.lt.u32.totalorder %s2396_s21, %s2608_s5 }
  0x39   :  { %p2402_p12 = pnand %p2400_p11, %p2397_p10 }
  0x3b   :  { %2405 = shalt.err (!%p2402_p12)
}
  0x3c   :  { %s2406_s1 = scalar_lea.vmem %s60_s17, 8192  ;;  %p2411_p0 = scmp.lt.s32.totalorder %s60_s17, %s60_s17 }
  0x3d   :  { %p2407_p13 = scmp.ne.s32.totalorder %s60_s17, %s2406_s1  ;;  %p2412_p1 = scmp.lt.s32.totalorder %s2406_s1, %s2406_s1 }
  0x3f   :  { %p2413_p2 = por %p2412_p1, %p2411_p0 }
  0x41   :  { %p2414_p3 = pnand %p2413_p2, %p2407_p13 }
  0x43   :  { %2417 = shalt.err (!%p2414_p3)
}
  0x44   :  { %s2456_s3 = smov 64   ;;  %s2457_s18 = smov 4  }
  0x45   :  { %65 = dma.hbm_to_vmem [thread:$0]  %s2608_s5, 8192, %s60_s17, [#allocation9], %s2456_s3, %s2456_s3, %s2457_s18  }
  0x46   :  { %2440 = dma.done.wait [#allocation3], 128  }
  0x47   :  { %2441 = vsyncadd [#allocation3], 4294967168 }
  0x48   :  { %2442 = dma.done.wait [#allocation6], 18432  }
  0x49   :  { %2443 = vsyncadd [#allocation6], 4294948864 }
  0x4a   :  { %2444 = dma.done.wait [#allocation9], 8192  }
  0x4b   :  { %2445 = vsyncadd [#allocation9], 4294959104  ;;  %v2458_v0 = vmov 0   ;;  %v2242_v1 = vld [vmem:[#allocation5 + $0x4] ss:$8 sps:$4 sm:$0xff]   ;;  %v81_v40 = vld [vmem:[#allocation2] sm:$0xff] }
  0x4c   :  { %223 = vmatprep.mubr.bf16.mxu0 %v2458_v0  ;;  %v2244_v2 = vld [vmem:[#allocation5] ss:$8 sps:$4 sm:$0xff]   ;;  %191 = vmatprep.subr.bf16.mxu0 %v2242_v1  ;;  %v2245_v3 = vld [vmem:[#allocation5 + $0x14] ss:$8 sps:$4 sm:$0xff]   ;;  %v2247_v4 = vld [vmem:[#allocation5 + $0x10] ss:$8 sps:$4 sm:$0xff]   ;;  %v82_v48 = vpack.c.bf16 %v81_v40, %v81_v40 }
  0x4d   :  { %192 = vmatpush1.bf16.msra.mxu0 %v2244_v2  ;;  %v2248_v5 = vld [vmem:[#allocation5 + $0x24] ss:$8 sps:$4 sm:$0xff]   ;;  %v2250_v6 = vld [vmem:[#allocation5 + $0x20] ss:$8 sps:$4 sm:$0xff]   ;;  %v2251_v7 = vld [vmem:[#allocation5 + $0x34] ss:$8 sps:$4 sm:$0xff]  }
  0x4e   :  { %193 = vmatprep.subr.bf16.mxu0 %v2245_v3  ;;  %v2253_v8 = vld [vmem:[#allocation5 + $0x30] ss:$8 sps:$4 sm:$0xff]   ;;  %v238_v9 = vld [vmem:[#allocation7] sm:$0xff]  ;;  %v2257_v21 = vld [vmem:[#allocation5 + $0x54] ss:$8 sps:$4 sm:$0xff]  }
  0x4f   :  { %v242_v10 = vld [vmem:[#allocation7 + $0x20] sm:$0xff]  ;;  %v2259_v25 = vld [vmem:[#allocation5 + $0x50] ss:$8 sps:$4 sm:$0xff]   ;;  %v2263_v33 = vld [vmem:[#allocation5 + $0x74] ss:$8 sps:$4 sm:$0xff]  }
  0x50   :  { %v2254_v11 = vld [vmem:[#allocation5 + $0x44] ss:$8 sps:$4 sm:$0xff]   ;;  %v1950_v12 = vcombine.high %v238_v9, %v242_v10  ;;  %v1949_v13 = vcombine.low %v238_v9, %v242_v10  ;;  %v2256_v19 = vld [vmem:[#allocation5 + $0x40] ss:$8 sps:$4 sm:$0xff]   ;;  %v2265_v39 = vld [vmem:[#allocation5 + $0x70] ss:$8 sps:$4 sm:$0xff]  }
  0x51   :  { %194 = vmatpush1.bf16.msra.mxu0 %v2247_v4  ;;  %v246_v14 = vld [vmem:[#allocation7 + $0x40] sm:$0xff]  ;;  %v239_v34 = vld [vmem:[#allocation7 + $0x8] sm:$0xff] }
  0x52   :  { %195 = vmatprep.subr.bf16.mxu0 %v2248_v5  ;;  %v250_v15 = vld [vmem:[#allocation7 + $0x60] sm:$0xff]  ;;  %1048 = vmatprep.subr.bf16.mxu1 %v1950_v12  ;;  %v243_v36 = vld [vmem:[#allocation7 + $0x28] sm:$0xff] }
  0x53   :  { %v1958_v16 = vcombine.high %v246_v14, %v250_v15  ;;  %v254_v17 = vld [vmem:[#allocation7 + $0x80] sm:$0xff]  ;;  %1049 = vmatpush1.bf16.msra.mxu1 %v1949_v13  ;;  %v1957_v20 = vcombine.low %v246_v14, %v250_v15  ;;  %v1952_v42 = vcombine.high %v239_v34, %v243_v36  ;;  %v247_v43 = vld [vmem:[#allocation7 + $0x48] sm:$0xff]  ;;  %v1951_v49 = vcombine.low %v239_v34, %v243_v36 }
  0x54   :  { %v258_v18 = vld [vmem:[#allocation7 + $0xa0] sm:$0xff]  ;;  %v251_v45 = vld [vmem:[#allocation7 + $0x68] sm:$0xff] }
  0x55   :  { %196 = vmatpush1.bf16.msra.mxu0 %v2250_v6  ;;  %1050 = vmatprep.subr.bf16.mxu1 %v1958_v16  ;;  %v1966_v22 = vcombine.high %v254_v17, %v258_v18  ;;  %v262_v23 = vld [vmem:[#allocation7 + $0xc0] sm:$0xff]  ;;  %v1965_v26 = vcombine.low %v254_v17, %v258_v18  ;;  %v255_v50 = vld [vmem:[#allocation7 + $0x88] sm:$0xff]  ;;  %v1960_v55 = vcombine.high %v247_v43, %v251_v45 }
  0x56   :  { %197 = vmatprep.subr.bf16.mxu0 %v2251_v7  ;;  %v266_v24 = vld [vmem:[#allocation7 + $0xe0] sm:$0xff]  ;;  %v259_v51 = vld [vmem:[#allocation7 + $0xa8] sm:$0xff]  ;;  %v1959_v57 = vcombine.low %v247_v43, %v251_v45 }
  0x57   :  { %1051 = vmatpush1.bf16.msra.mxu1 %v1957_v20  ;;  %v2260_v27 = vld [vmem:[#allocation5 + $0x64] ss:$8 sps:$4 sm:$0xff]   ;;  %v1974_v28 = vcombine.high %v262_v23, %v266_v24  ;;  %v2262_v31 = vld [vmem:[#allocation5 + $0x60] ss:$8 sps:$4 sm:$0xff]   ;;  %v1973_v32 = vcombine.low %v262_v23, %v266_v24  ;;  %v1968_v63 = vcombine.high %v255_v50, %v259_v51  ;;  %v1967_v1 = vcombine.low %v255_v50, %v259_v51 }
  0x58   :  { %1052 = vmatprep.subr.bf16.mxu1 %v1966_v22  ;;  %v270_v29 = vld [vmem:[#allocation7 + $0x100] sm:$0xff]  ;;  %v263_v58 = vld [vmem:[#allocation7 + $0xc8] sm:$0xff] }
  0x59   :  { %198 = vmatpush1.bf16.msra.mxu0 %v2253_v8  ;;  %v274_v30 = vld [vmem:[#allocation7 + $0x120] sm:$0xff]  ;;  %v267_v59 = vld [vmem:[#allocation7 + $0xe8] sm:$0xff] }
  0x5a   :  { %199 = vmatprep.subr.bf16.mxu0 %v2254_v11  ;;  %v1982_v35 = vcombine.high %v270_v29, %v274_v30  ;;  %v278_v37 = vld [vmem:[#allocation7 + $0x140] sm:$0xff]  ;;  %v1981_v41 = vcombine.low %v270_v29, %v274_v30  ;;  %v271_v2 = vld [vmem:[#allocation7 + $0x108] sm:$0xff]  ;;  %v1976_v7 = vcombine.high %v263_v58, %v267_v59  ;;  %v1975_v9 = vcombine.low %v263_v58, %v267_v59 }
  0x5b   :  { %1053 = vmatpush1.bf16.msra.mxu1 %v1965_v26  ;;  %v282_v38 = vld [vmem:[#allocation7 + $0x160] sm:$0xff]  ;;  %v275_v3 = vld [vmem:[#allocation7 + $0x128] sm:$0xff] }
  0x5c   :  { %1054 = vmatprep.subr.bf16.mxu1 %v1974_v28  ;;  %v1990_v44 = vcombine.high %v278_v37, %v282_v38  ;;  %v286_v46 = vld [vmem:[#allocation7 + $0x180] sm:$0xff]  ;;  %v1989_v52 = vcombine.low %v278_v37, %v282_v38  ;;  %v279_v10 = vld [vmem:[#allocation7 + $0x148] sm:$0xff]  ;;  %v1984_v15 = vcombine.high %v271_v2, %v275_v3  ;;  %v1983_v17 = vcombine.low %v271_v2, %v275_v3 }
  0x5d   :  { %200 = vmatpush1.bf16.msra.mxu0 %v2256_v19  ;;  %v290_v47 = vld [vmem:[#allocation7 + $0x1a0] sm:$0xff]  ;;  %v283_v11 = vld [vmem:[#allocation7 + $0x168] sm:$0xff] }
  0x5e   :  { %201 = vmatprep.subr.bf16.mxu0 %v2257_v21  ;;  %v294_v53 = vld [vmem:[#allocation7 + $0x1c0] sm:$0xff]  ;;  %v1998_v56 = vcombine.high %v286_v46, %v290_v47  ;;  %v1997_v60 = vcombine.low %v286_v46, %v290_v47  ;;  %v287_v18 = vld [vmem:[#allocation7 + $0x188] sm:$0xff]  ;;  %v1992_v23 = vcombine.high %v279_v10, %v283_v11 }
  0x5f   :  { %1055 = vmatpush1.bf16.msra.mxu1 %v1973_v32  ;;  %v298_v54 = vld [vmem:[#allocation7 + $0x1e0] sm:$0xff]  ;;  %v291_v19 = vld [vmem:[#allocation7 + $0x1a8] sm:$0xff] }
  0x60   :  { %1056 = vmatprep.subr.bf16.mxu1 %v1982_v35  ;;  %v302_v61 = vld [vmem:[#allocation7 + $0x200] sm:$0xff]  ;;  %v2006_v0 = vcombine.high %v294_v53, %v298_v54  ;;  %v2005_v4 = vcombine.low %v294_v53, %v298_v54  ;;  %v295_v26 = vld [vmem:[#allocation7 + $0x1c8] sm:$0xff] }
  0x61   :  { %202 = vmatpush1.bf16.msra.mxu0 %v2259_v25  ;;  %v306_v62 = vld [vmem:[#allocation7 + $0x220] sm:$0xff]  ;;  %v1991_v25 = vcombine.low %v279_v10, %v283_v11  ;;  %v303_v34 = vld [vmem:[#allocation7 + $0x208] sm:$0xff] }
  0x62   :  { %203 = vmatprep.subr.bf16.mxu0 %v2260_v27  ;;  %v310_v5 = vld [vmem:[#allocation7 + $0x240] sm:$0xff]  ;;  %v2014_v8 = vcombine.high %v302_v61, %v306_v62  ;;  %v2013_v12 = vcombine.low %v302_v61, %v306_v62  ;;  %v299_v27 = vld [vmem:[#allocation7 + $0x1e8] sm:$0xff] }
  0x63   :  { %1057 = vmatpush1.bf16.msra.mxu1 %v1981_v41  ;;  %v314_v6 = vld [vmem:[#allocation7 + $0x260] sm:$0xff]  ;;  %v307_v35 = vld [vmem:[#allocation7 + $0x228] sm:$0xff]  ;;  %v2007_v41 = vcombine.low %v295_v26, %v299_v27 }
  0x64   :  { %1058 = vmatprep.subr.bf16.mxu1 %v1990_v44  ;;  %v318_v13 = vld [vmem:[#allocation7 + $0x280] sm:$0xff]  ;;  %v2022_v16 = vcombine.high %v310_v5, %v314_v6  ;;  %v2021_v20 = vcombine.low %v310_v5, %v314_v6  ;;  %v315_v43 = vld [vmem:[#allocation7 + $0x268] sm:$0xff]  ;;  %v2016_v45 = vcombine.high %v303_v34, %v307_v35  ;;  %v2015_v47 = vcombine.low %v303_v34, %v307_v35 }
  0x65   :  { %204 = vmatpush1.bf16.msra.mxu0 %v2262_v31  ;;  %v322_v14 = vld [vmem:[#allocation7 + $0x2a0] sm:$0xff]  ;;  %v2000_v31 = vcombine.high %v287_v18, %v291_v19  ;;  %v327_v53 = vld [vmem:[#allocation7 + $0x2c8] sm:$0xff] }
  0x66   :  { %205 = vmatprep.subr.bf16.mxu0 %v2263_v33  ;;  %v326_v21 = vld [vmem:[#allocation7 + $0x2c0] sm:$0xff]  ;;  %v2030_v24 = vcombine.high %v318_v13, %v322_v14  ;;  %v2029_v28 = vcombine.low %v318_v13, %v322_v14  ;;  %v1999_v33 = vcombine.low %v287_v18, %v291_v19  ;;  %v331_v54 = vld [vmem:[#allocation7 + $0x2e8] sm:$0xff]  ;;  %v240_v19 = vld [vmem:[#allocation7 + $0x10] sm:$0xff] }
  0x67   :  { %1059 = vmatpush1.bf16.msra.mxu1 %v1989_v52  ;;  %v330_v22 = vld [vmem:[#allocation7 + $0x2e0] sm:$0xff]  ;;  %v335_v58 = vld [vmem:[#allocation7 + $0x308] sm:$0xff] }
  0x68   :  { %1060 = vmatprep.subr.bf16.mxu1 %v1998_v56  ;;  %v334_v29 = vld [vmem:[#allocation7 + $0x300] sm:$0xff]  ;;  %v2038_v32 = vcombine.high %v326_v21, %v330_v22  ;;  %v2037_v36 = vcombine.low %v326_v21, %v330_v22  ;;  %v339_v59 = vld [vmem:[#allocation7 + $0x328] sm:$0xff]  ;;  %v241_v21 = vld [vmem:[#allocation7 + $0x18] sm:$0xff] }
  0x69   :  { %206 = vmatpush1.bf16.msra.mxu0 %v2265_v39  ;;  %v338_v30 = vld [vmem:[#allocation7 + $0x320] sm:$0xff]  ;;  %v2008_v39 = vcombine.high %v295_v26, %v299_v27  ;;  %v2048_v61 = vcombine.high %v335_v58, %v339_v59  ;;  %v343_v62 = vld [vmem:[#allocation7 + $0x348] sm:$0xff]  ;;  %v101_v27 = vlaneseq }
  0x6a   :  { %1089 = vmatprep.subr.bf16.mxu0 %v1952_v42  ;;  %v342_v37 = vld [vmem:[#allocation7 + $0x340] sm:$0xff]  ;;  %v2046_v40 = vcombine.high %v334_v29, %v338_v30  ;;  %v311_v42 = vld [vmem:[#allocation7 + $0x248] sm:$0xff]  ;;  %v2045_v44 = vcombine.low %v334_v29, %v338_v30  ;;  %v99_v30 = vld [vmem:[%s2605_s2] sm:$0x3] }
  0x6b   :  { %1061 = vmatpush1.bf16.msra.mxu1 %v1997_v60  ;;  %v346_v38 = vld [vmem:[#allocation7 + $0x360] sm:$0xff]  ;;  %v2024_v51 = vcombine.high %v311_v42, %v315_v43  ;;  %v2023_v52 = vcombine.low %v311_v42, %v315_v43  ;;  %v2039_v60 = vcombine.low %v327_v53, %v331_v54  ;;  %v351_v5 = vld [vmem:[#allocation7 + $0x388] sm:$0xff] }
  0x6c   :  { %224 = vmatmul.mubr.bf16.vlgmr.msra.gmra.mrb[0].mxu0 %v82_v48  ;;  %1062 = vmatprep.subr.bf16.mxu1 %v2006_v0  ;;  %v2054_v46 = vcombine.high %v342_v37, %v346_v38  ;;  %v319_v48 = vld [vmem:[#allocation7 + $0x288] sm:$0xff]  ;;  %v2053_v50 = vcombine.low %v342_v37, %v346_v38  ;;  %v2047_v0 = vcombine.low %v335_v58, %v339_v59  ;;  %v350_v3 = vld [vmem:[#allocation7 + $0x380] sm:$0xff] }
  0x6d   :  { %1090 = vmatpush1.bf16.msra.mxu0 %v1951_v49  ;;  %v323_v49 = vld [vmem:[#allocation7 + $0x2a8] sm:$0xff]  ;;  %v358_v11 = vld [vmem:[#allocation7 + $0x3c0] sm:$0xff] }
  0x6e   :  { %1091 = vmatprep.subr.bf16.mxu0 %v1960_v55  ;;  %v2032_v55 = vcombine.high %v319_v48, %v323_v49  ;;  %v2031_v56 = vcombine.low %v319_v48, %v323_v49  ;;  %v359_v13 = vld [vmem:[#allocation7 + $0x3c8] sm:$0xff] }
  0x6f   :  { %1063 = vmatpush1.bf16.msra.mxu1 %v2005_v4  ;;  %v354_v4 = vld [vmem:[#allocation7 + $0x3a0] sm:$0xff] }
  0x70   :  { %1064 = vmatprep.subr.bf16.mxu1 %v2014_v8  ;;  %v2062_v6 = vcombine.high %v350_v3, %v354_v4  ;;  %v2061_v10 = vcombine.low %v350_v3, %v354_v4  ;;  %v272_v4 = vld [vmem:[#allocation7 + $0x110] sm:$0xff] }
  0x71   :  { %1092 = vmatpush1.bf16.msra.mxu0 %v1959_v57  ;;  %v2040_v57 = vcombine.high %v327_v53, %v331_v54  ;;  %v260_v53 = vld [vmem:[#allocation7 + $0xb0] sm:$0xff]  ;;  %v257_v54 = vld [vmem:[#allocation7 + $0x98] sm:$0xff] }
  0x72   :  { %1093 = vmatprep.subr.bf16.mxu0 %v1968_v63  ;;  %v347_v63 = vld [vmem:[#allocation7 + $0x368] sm:$0xff] }
  0x73   :  { %1065 = vmatpush1.bf16.msra.mxu1 %v2013_v12  ;;  %v2055_v2 = vcombine.low %v343_v62, %v347_v63  ;;  %v362_v12 = vld [vmem:[#allocation7 + $0x3e0] sm:$0xff] }
  0x74   :  { %1066 = vmatprep.subr.bf16.mxu1 %v2022_v16  ;;  %v2070_v14 = vcombine.high %v358_v11, %v362_v12  ;;  %v2069_v18 = vcombine.low %v358_v11, %v362_v12  ;;  %v280_v12 = vld [vmem:[#allocation7 + $0x150] sm:$0xff] }
  0x75   :  { %1094 = vmatpush1.bf16.msra.mxu0 %v1967_v1  ;;  %v2056_v1 = vcombine.high %v343_v62, %v347_v63  ;;  %v265_v62 = vld [vmem:[#allocation7 + $0xd8] sm:$0xff] }
  0x76   :  { %1095 = vmatprep.subr.bf16.mxu0 %v1976_v7  ;;  %v355_v7 = vld [vmem:[#allocation7 + $0x3a8] sm:$0xff]  ;;  %v269_v63 = vld [vmem:[#allocation7 + $0xf8] sm:$0xff] }
  0x77   :  { %1067 = vmatpush1.bf16.msra.mxu1 %v2021_v20  ;;  %v2063_v8 = vcombine.low %v351_v5, %v355_v7  ;;  %v244_v20 = vld [vmem:[#allocation7 + $0x30] sm:$0xff]  ;;  %v1980_v3 = vcombine.high %v265_v62, %v269_v63 }
  0x78   :  { %1068 = vmatprep.subr.bf16.mxu1 %v2030_v24  ;;  %v1954_v22 = vcombine.high %v240_v19, %v244_v20  ;;  %v1953_v24 = vcombine.low %v240_v19, %v244_v20  ;;  %v288_v20 = vld [vmem:[#allocation7 + $0x190] sm:$0xff] }
  0x79   :  { %1096 = vmatpush1.bf16.msra.mxu0 %v1975_v9  ;;  %v2064_v9 = vcombine.high %v351_v5, %v355_v7  ;;  %v276_v5 = vld [vmem:[#allocation7 + $0x130] sm:$0xff]  ;;  %v277_v7 = vld [vmem:[#allocation7 + $0x138] sm:$0xff] }
  0x7a   :  { %1097 = vmatprep.subr.bf16.mxu0 %v1984_v15  ;;  %v363_v15 = vld [vmem:[#allocation7 + $0x3e8] sm:$0xff] }
  0x7b   :  { %1069 = vmatpush1.bf16.msra.mxu1 %v2029_v28  ;;  %v2071_v16 = vcombine.low %v359_v13, %v363_v15  ;;  %v2548_v28 = vshrl.u32 %v101_v27, 7 }
  0x7c   :  { %1070 = vmatprep.subr.bf16.mxu1 %v2038_v32 }
  0x7d   :  { %1098 = vmatpush1.bf16.msra.mxu0 %v1983_v17  ;;  %v2072_v17 = vcombine.high %v359_v13, %v363_v15  ;;  %v103_v29 = vsub.s32 0, %v2548_v28  ;;  %v284_v13 = vld [vmem:[#allocation7 + $0x170] sm:$0xff]  ;;  %v285_v15 = vld [vmem:[#allocation7 + $0x178] sm:$0xff] }
  0x7e   :  { %1099 = vmatprep.subr.bf16.mxu0 %v1992_v23  ;;  %v245_v23 = vld [vmem:[#allocation7 + $0x38] sm:$0xff] }
  0x7f   :  { %1071 = vmatpush1.bf16.msra.mxu1 %v2037_v36  ;;  %v1956_v26 = vcombine.high %v241_v21, %v245_v23  ;;  %v104_v32 = vrot.slane %v99_v30, %v103_v29 }
  0x80   :  { %1072 = vmatprep.subr.bf16.mxu1 %v2046_v40 }
  0x81   :  { %1100 = vmatpush1.bf16.msra.mxu0 %v1991_v25  ;;  %v1955_v25 = vcombine.low %v241_v21, %v245_v23  ;;  %v292_v21 = vld [vmem:[#allocation7 + $0x1b0] sm:$0xff]  ;;  %v293_v23 = vld [vmem:[#allocation7 + $0x1b8] sm:$0xff] }
  0x82   :  { %1101 = vmatprep.subr.bf16.mxu0 %v2000_v31  ;;  %v107_v31 = vsub.s32 1, %v2548_v28 }
  0x83   :  { %1073 = vmatpush1.bf16.msra.mxu1 %v2045_v44  ;;  %v248_v44 = vld [vmem:[#allocation7 + $0x50] sm:$0xff] }
  0x84   :  { %1074 = vmatprep.subr.bf16.mxu1 %v2054_v46  ;;  %v249_v46 = vld [vmem:[#allocation7 + $0x58] sm:$0xff] }
  0x85   :  { %1102 = vmatpush1.bf16.msra.mxu0 %v1999_v33  ;;  %v108_v33 = vrot.slane %v99_v30, %v107_v31  ;;  %v296_v30 = vld [vmem:[#allocation7 + $0x1d0] sm:$0xff] }
  0x86   :  { %1103 = vmatprep.subr.bf16.mxu0 %v2008_v39 }
  0x87   :  { %1075 = vmatpush1.bf16.msra.mxu1 %v2053_v50  ;;  %v256_v50 = vld [vmem:[#allocation7 + $0x90] sm:$0xff] }
  0x88   :  { %1076 = vmatprep.subr.bf16.mxu1 %v2062_v6  ;;  %v1970_v58 = vcombine.high %v256_v50, %v260_v53  ;;  %v273_v6 = vld [vmem:[#allocation7 + $0x118] sm:$0xff] }
  0x89   :  { %1104 = vmatpush1.bf16.msra.mxu0 %v2007_v41  ;;  %v1988_v11 = vcombine.high %v273_v6, %v277_v7 }
  0x8a   :  { %1105 = vmatprep.subr.bf16.mxu0 %v2016_v45  ;;  %v252_v45 = vld [vmem:[#allocation7 + $0x70] sm:$0xff] }
  0x8b   :  { %1077 = vmatpush1.bf16.msra.mxu1 %v2061_v10  ;;  %v1986_v10 = vcombine.high %v272_v4, %v276_v5 }
  0x8c   :  { %1078 = vmatprep.subr.bf16.mxu1 %v2070_v14  ;;  %v281_v14 = vld [vmem:[#allocation7 + $0x158] sm:$0xff] }
  0x8d   :  { %1106 = vmatpush1.bf16.msra.mxu0 %v2015_v47  ;;  %v253_v47 = vld [vmem:[#allocation7 + $0x78] sm:$0xff]  ;;  %v1996_v19 = vcombine.high %v281_v14, %v285_v15 }
  0x8e   :  { %1107 = vmatprep.subr.bf16.mxu0 %v2024_v51  ;;  %v1962_v51 = vcombine.high %v248_v44, %v252_v45 }
  0x8f   :  { %1079 = vmatpush1.bf16.msra.mxu1 %v2069_v18  ;;  %v1994_v18 = vcombine.high %v280_v12, %v284_v13 }
  0x90   :  { %1130 = vmatprep.subr.bf16.mxu1 %v1954_v22  ;;  %v289_v22 = vld [vmem:[#allocation7 + $0x198] sm:$0xff] }
  0x91   :  { %1108 = vmatpush1.bf16.msra.mxu0 %v2023_v52  ;;  %v1964_v52 = vcombine.high %v249_v46, %v253_v47  ;;  %v2004_v27 = vcombine.high %v289_v22, %v293_v23 }
  0x92   :  { %1109 = vmatprep.subr.bf16.mxu0 %v2032_v55  ;;  %v261_v55 = vld [vmem:[#allocation7 + $0xb8] sm:$0xff] }
  0x93   :  { %v1972_v59 = vcombine.high %v257_v54, %v261_v55 }
  0x95   :  { %1110 = vmatpush1.bf16.msra.mxu0 %v2031_v56  ;;  %v1961_v56 = vcombine.low %v248_v44, %v252_v45 }
  0x96   :  { %1111 = vmatprep.subr.bf16.mxu0 %v2040_v57  ;;  %v1963_v57 = vcombine.low %v249_v46, %v253_v47  ;;  %v312_v47 = vld [vmem:[#allocation7 + $0x250] sm:$0xff] }
  0x99   :  { %1112 = vmatpush1.bf16.msra.mxu0 %v2039_v60  ;;  %v264_v60 = vld [vmem:[#allocation7 + $0xd0] sm:$0xff] }
  0x9a   :  { %1113 = vmatprep.subr.bf16.mxu0 %v2048_v61  ;;  %v268_v61 = vld [vmem:[#allocation7 + $0xf0] sm:$0xff] }
  0x9d   :  { %1114 = vmatpush1.bf16.msra.mxu0 %v2047_v0  ;;  %v1969_v0 = vcombine.low %v256_v50, %v260_v53  ;;  %v313_v50 = vld [vmem:[#allocation7 + $0x258] sm:$0xff] }
  0x9e   :  { %1115 = vmatprep.subr.bf16.mxu0 %v2056_v1  ;;  %v1971_v1 = vcombine.low %v257_v54, %v261_v55 }
  0xa1   :  { %1116 = vmatpush1.bf16.msra.mxu0 %v2055_v2  ;;  %v1978_v2 = vcombine.high %v264_v60, %v268_v61 }
  0xa2   :  { %1117 = vmatprep.subr.bf16.mxu0 %v2064_v9  ;;  %v1979_v9 = vcombine.low %v265_v62, %v269_v63 }
  0xa5   :  { %1118 = vmatpush1.bf16.msra.mxu0 %v2063_v8  ;;  %v1977_v8 = vcombine.low %v264_v60, %v268_v61 }
  0xa6   :  { %1119 = vmatprep.subr.bf16.mxu0 %v2072_v17  ;;  %v1987_v17 = vcombine.low %v273_v6, %v277_v7 }
  0xa9   :  { %1120 = vmatpush1.bf16.msra.mxu0 %v2071_v16  ;;  %v1985_v16 = vcombine.low %v272_v4, %v276_v5 }
  0xaa   :  { %1171 = vmatprep.subr.bf16.mxu0 %v1956_v26  ;;  %v2002_v26 = vcombine.high %v288_v20, %v292_v21 }
 0x13f   :  { %v225_v34 = vpop.f32.mrb[0].mxu0 }
 0x140   :  { %v226_v35 = vadd.f32 %v225_v34, %v104_v32  ;;  %v227_v36 = vpop.f32.mrb[1].mxu0  ;;  %v300_v32 = vld [vmem:[#allocation7 + $0x1f0] sm:$0xff]  ;;  %v301_v34 = vld [vmem:[#allocation7 + $0x1f8] sm:$0xff] }
 0x141   :  { %v228_v37 = vadd.f32 %v227_v36, %v108_v33  ;;  %v229_v38 = vpop.f32.mrb[2].mxu0  ;;  %v297_v33 = vld [vmem:[#allocation7 + $0x1d8] sm:$0xff]  ;;  %v2003_v36 = vcombine.low %v289_v22, %v293_v23 }
 0x142   :  { %v232_v39 = vmul.f32 0.01, %v226_v35  ;;  %v230_v40 = vpop.f32.mrb[3].mxu0  ;;  %v2012_v38 = vcombine.high %v297_v33, %v301_v34  ;;  %v2011_v44 = vcombine.low %v297_v33, %v301_v34 }
 0x143   :  { %v233_v41 = vmul.f32 0.01, %v228_v37  ;;  %v308_v40 = vld [vmem:[#allocation7 + $0x230] sm:$0xff] }
 0x144   :  { %v234_v42 = vmax.f32 %v226_v35, %v232_v39  ;;  %v2001_v35 = vcombine.low %v288_v20, %v292_v21  ;;  %v304_v39 = vld [vmem:[#allocation7 + $0x210] sm:$0xff] }
 0x145   :  { %v235_v43 = vmax.f32 %v228_v37, %v233_v41  ;;  %v2010_v37 = vcombine.high %v296_v30, %v300_v32  ;;  %v305_v41 = vld [vmem:[#allocation7 + $0x218] sm:$0xff]  ;;  %v2018_v45 = vcombine.high %v304_v39, %v308_v40 }
 0x146   :  { %v2559_v49 = vpack.c.bf16 %v234_v42, %v234_v42  ;;  %v309_v42 = vld [vmem:[#allocation7 + $0x238] sm:$0xff] }
 0x147   :  { %v237_v48 = vpack.c.bf16 %v235_v43, %v235_v43  ;;  %v2009_v43 = vcombine.low %v296_v30, %v300_v32  ;;  %v2020_v46 = vcombine.high %v305_v41, %v309_v42  ;;  %v2019_v53 = vcombine.low %v305_v41, %v309_v42 }
 0x149   :  { %1080 = vmatprep.mubr.bf16.mxu1 %v237_v48  ;;  %1121 = vmatprep.mubr.bf16.mxu0 %v237_v48 }
 0x14a   :  { %1081 = vmatmul.mubr.bf16.vlgmr.msra.gmra.mrb[0].mxu1 %v2559_v49  ;;  %1122 = vmatmul.mubr.bf16.vlgmr.msra.gmra.mrb[4].mxu0 %v2559_v49 }
 0x14b   :  { %1131 = vmatpush1.bf16.msra.mxu1 %v1953_v24  ;;  %1172 = vmatpush1.bf16.msra.mxu0 %v1955_v25  ;;  %v1993_v24 = vcombine.low %v280_v12, %v284_v13  ;;  %v1995_v25 = vcombine.low %v281_v14, %v285_v15 }
 0x14c   :  { %1162 = vmatprep.mubr.bf16.mxu1 %v237_v48  ;;  %1203 = vmatprep.mubr.bf16.mxu0 %v237_v48  ;;  %v316_v48 = vld [vmem:[#allocation7 + $0x270] sm:$0xff] }
 0x14d   :  { %1132 = vmatprep.subr.bf16.mxu1 %v1962_v51  ;;  %1173 = vmatprep.subr.bf16.mxu0 %v1964_v52  ;;  %v317_v51 = vld [vmem:[#allocation7 + $0x278] sm:$0xff]  ;;  %v2017_v52 = vcombine.low %v304_v39, %v308_v40  ;;  %v2026_v54 = vcombine.high %v312_v47, %v316_v48  ;;  %v2025_v60 = vcombine.low %v312_v47, %v316_v48  ;;  %v2268_v47 = vld [vmem:[#allocation8] sm:$0xff]  }
 0x14e   :  { %v2028_v55 = vcombine.high %v313_v50, %v317_v51  ;;  %v2027_v61 = vcombine.low %v313_v50, %v317_v51  ;;  %v2269_v48 = vld [vmem:[#allocation8 + $0x80] sm:$0xff]   ;;  %v2270_v50 = vld [vmem:[#allocation8 + $0x48] sm:$0xff]  }
 0x14f   :  { %1133 = vmatpush1.bf16.msra.mxu1 %v1961_v56  ;;  %1174 = vmatpush1.bf16.msra.mxu0 %v1963_v57  ;;  %v320_v56 = vld [vmem:[#allocation7 + $0x290] sm:$0xff]  ;;  %v2271_v51 = vld [vmem:[#allocation8 + $0xc8] sm:$0xff]  }
 0x150   :  { %1134 = vmatprep.subr.bf16.mxu1 %v1970_v58  ;;  %1175 = vmatprep.subr.bf16.mxu0 %v1972_v59  ;;  %v324_v57 = vld [vmem:[#allocation7 + $0x2b0] sm:$0xff]  ;;  %v321_v58 = vld [vmem:[#allocation7 + $0x298] sm:$0xff] }
 0x151   :  { %v325_v59 = vld [vmem:[#allocation7 + $0x2b8] sm:$0xff]  ;;  %v2034_v62 = vcombine.high %v320_v56, %v324_v57  ;;  %v2033_v4 = vcombine.low %v320_v56, %v324_v57  ;;  %v2276_v56 = vld [vmem:[#allocation8 + $0x10] sm:$0xff]  }
 0x152   :  { %v2036_v63 = vcombine.high %v321_v58, %v325_v59  ;;  %v2035_v5 = vcombine.low %v321_v58, %v325_v59  ;;  %v2277_v57 = vld [vmem:[#allocation8 + $0x90] sm:$0xff]   ;;  %v2278_v58 = vld [vmem:[#allocation8 + $0x58] sm:$0xff]  }
 0x153   :  { %1135 = vmatpush1.bf16.msra.mxu1 %v1969_v0  ;;  %1176 = vmatpush1.bf16.msra.mxu0 %v1971_v1  ;;  %v328_v0 = vld [vmem:[#allocation7 + $0x2d0] sm:$0xff]  ;;  %v2279_v59 = vld [vmem:[#allocation8 + $0xd8] sm:$0xff]  }
 0x154   :  { %1136 = vmatprep.subr.bf16.mxu1 %v1978_v2  ;;  %1177 = vmatprep.subr.bf16.mxu0 %v1980_v3  ;;  %v332_v1 = vld [vmem:[#allocation7 + $0x2f0] sm:$0xff]  ;;  %v329_v2 = vld [vmem:[#allocation7 + $0x2d8] sm:$0xff] }
 0x155   :  { %v333_v3 = vld [vmem:[#allocation7 + $0x2f8] sm:$0xff]  ;;  %v2042_v6 = vcombine.high %v328_v0, %v332_v1  ;;  %v2041_v12 = vcombine.low %v328_v0, %v332_v1  ;;  %v2285_v0 = vld [vmem:[#allocation8 + $0xa0] sm:$0xff]   ;;  %v2286_v1 = vld [vmem:[#allocation8 + $0x68] sm:$0xff]  }
 0x156   :  { %v2044_v7 = vcombine.high %v329_v2, %v333_v3  ;;  %v2043_v13 = vcombine.low %v329_v2, %v333_v3  ;;  %v2287_v2 = vld [vmem:[#allocation8 + $0xe8] sm:$0xff]  }
 0x157   :  { %1137 = vmatpush1.bf16.msra.mxu1 %v1977_v8  ;;  %1178 = vmatpush1.bf16.msra.mxu0 %v1979_v9  ;;  %v336_v8 = vld [vmem:[#allocation7 + $0x310] sm:$0xff]  ;;  %v2288_v3 = vld [vmem:[#allocation8 + $0x28] sm:$0xff]  }
 0x158   :  { %1138 = vmatprep.subr.bf16.mxu1 %v1986_v10  ;;  %1179 = vmatprep.subr.bf16.mxu0 %v1988_v11  ;;  %v340_v9 = vld [vmem:[#allocation7 + $0x330] sm:$0xff]  ;;  %v337_v10 = vld [vmem:[#allocation7 + $0x318] sm:$0xff] }
 0x159   :  { %v341_v11 = vld [vmem:[#allocation7 + $0x338] sm:$0xff]  ;;  %v2050_v14 = vcombine.high %v336_v8, %v340_v9  ;;  %v2049_v20 = vcombine.low %v336_v8, %v340_v9  ;;  %v2293_v8 = vld [vmem:[#allocation8 + $0xb0] sm:$0xff]  }
 0x15a   :  { %v2052_v15 = vcombine.high %v337_v10, %v341_v11  ;;  %v2051_v21 = vcombine.low %v337_v10, %v341_v11  ;;  %v2294_v9 = vld [vmem:[#allocation8 + $0x78] sm:$0xff]  }
 0x15b   :  { %1139 = vmatpush1.bf16.msra.mxu1 %v1985_v16  ;;  %1180 = vmatpush1.bf16.msra.mxu0 %v1987_v17  ;;  %v344_v16 = vld [vmem:[#allocation7 + $0x350] sm:$0xff]  ;;  %v2295_v10 = vld [vmem:[#allocation8 + $0xf8] sm:$0xff]  }
 0x15c   :  { %1140 = vmatprep.subr.bf16.mxu1 %v1994_v18  ;;  %1181 = vmatprep.subr.bf16.mxu0 %v1996_v19  ;;  %v348_v17 = vld [vmem:[#allocation7 + $0x370] sm:$0xff]  ;;  %v345_v18 = vld [vmem:[#allocation7 + $0x358] sm:$0xff] }
 0x15d   :  { %v349_v19 = vld [vmem:[#allocation7 + $0x378] sm:$0xff]  ;;  %v2058_v22 = vcombine.high %v344_v16, %v348_v17  ;;  %v2057_v30 = vcombine.low %v344_v16, %v348_v17  ;;  %v382_v17 = vsub.s32 3, %v2548_v28 }
 0x15e   :  { %v2060_v23 = vcombine.high %v345_v18, %v349_v19  ;;  %v2059_v32 = vcombine.low %v345_v18, %v349_v19  ;;  %v2296_v11 = vld [vmem:[#allocation8 + $0x38] sm:$0xff]  }
 0x15f   :  { %1141 = vmatpush1.bf16.msra.mxu1 %v1993_v24  ;;  %1182 = vmatpush1.bf16.msra.mxu0 %v1995_v25  ;;  %v352_v24 = vld [vmem:[#allocation7 + $0x390] sm:$0xff]  ;;  %v2569_v16 = vld [vmem:[%s2607_s4] sm:$0xff] }
 0x160   :  { %1142 = vmatprep.subr.bf16.mxu1 %v2002_v26  ;;  %1183 = vmatprep.subr.bf16.mxu0 %v2004_v27  ;;  %v356_v25 = vld [vmem:[#allocation7 + $0x3b0] sm:$0xff]  ;;  %v353_v26 = vld [vmem:[#allocation7 + $0x398] sm:$0xff]  ;;  %v371_v18 = vrot.slane %v2569_v16, %v103_v29 }
 0x161   :  { %v357_v27 = vld [vmem:[#allocation7 + $0x3b8] sm:$0xff]  ;;  %v2066_v33 = vcombine.high %v352_v24, %v356_v25  ;;  %v2065_v39 = vcombine.low %v352_v24, %v356_v25 }
 0x162   :  { %v2068_v34 = vcombine.high %v353_v26, %v357_v27  ;;  %v2067_v40 = vcombine.low %v353_v26, %v357_v27 }
 0x163   :  { %1143 = vmatpush1.bf16.msra.mxu1 %v2001_v35  ;;  %1184 = vmatpush1.bf16.msra.mxu0 %v2003_v36  ;;  %v360_v35 = vld [vmem:[#allocation7 + $0x3d0] sm:$0xff] }
 0x164   :  { %1144 = vmatprep.subr.bf16.mxu1 %v2010_v37  ;;  %1185 = vmatprep.subr.bf16.mxu0 %v2012_v38  ;;  %v364_v36 = vld [vmem:[#allocation7 + $0x3f0] sm:$0xff]  ;;  %v361_v37 = vld [vmem:[#allocation7 + $0x3d8] sm:$0xff] }
 0x165   :  { %v365_v38 = vld [vmem:[#allocation7 + $0x3f8] sm:$0xff]  ;;  %v2074_v41 = vcombine.high %v360_v35, %v364_v36 }
 0x166   :  { %v2076_v42 = vcombine.high %v361_v37, %v365_v38 }
 0x167   :  { %1145 = vmatpush1.bf16.msra.mxu1 %v2009_v43  ;;  %1186 = vmatpush1.bf16.msra.mxu0 %v2011_v44  ;;  %v2073_v43 = vcombine.low %v360_v35, %v364_v36  ;;  %v2075_v44 = vcombine.low %v361_v37, %v365_v38 }
 0x168   :  { %1146 = vmatprep.subr.bf16.mxu1 %v2018_v45  ;;  %1187 = vmatprep.subr.bf16.mxu0 %v2020_v46  ;;  %v2266_v45 = vld [vmem:[#allocation8 + $0x40] sm:$0xff]  }
 0x169   :  { %v2267_v46 = vld [vmem:[#allocation8 + $0xc0] sm:$0xff]  }
 0x16b   :  { %1147 = vmatpush1.bf16.msra.mxu1 %v2017_v52  ;;  %1188 = vmatpush1.bf16.msra.mxu0 %v2019_v53  ;;  %v2272_v52 = vld [vmem:[#allocation8 + $0x8] sm:$0xff]  }
 0x16c   :  { %1148 = vmatprep.subr.bf16.mxu1 %v2026_v54  ;;  %1189 = vmatprep.subr.bf16.mxu0 %v2028_v55  ;;  %v2273_v53 = vld [vmem:[#allocation8 + $0x88] sm:$0xff]   ;;  %v2274_v54 = vld [vmem:[#allocation8 + $0x50] sm:$0xff]  }
 0x16d   :  { %v2275_v55 = vld [vmem:[#allocation8 + $0xd0] sm:$0xff]  }
 0x16f   :  { %1149 = vmatpush1.bf16.msra.mxu1 %v2025_v60  ;;  %1190 = vmatpush1.bf16.msra.mxu0 %v2027_v61  ;;  %v2280_v60 = vld [vmem:[#allocation8 + $0x18] sm:$0xff]   ;;  %v2282_v61 = vld [vmem:[#allocation8 + $0x60] sm:$0xff]  }
 0x170   :  { %1150 = vmatprep.subr.bf16.mxu1 %v2034_v62  ;;  %1191 = vmatprep.subr.bf16.mxu0 %v2036_v63  ;;  %v2283_v62 = vld [vmem:[#allocation8 + $0xe0] sm:$0xff]  }
 0x171   :  { %v2284_v63 = vld [vmem:[#allocation8 + $0x20] sm:$0xff]  }
 0x173   :  { %1151 = vmatpush1.bf16.msra.mxu1 %v2033_v4  ;;  %1192 = vmatpush1.bf16.msra.mxu0 %v2035_v5  ;;  %v2289_v4 = vld [vmem:[#allocation8 + $0xa8] sm:$0xff]   ;;  %v2290_v5 = vld [vmem:[#allocation8 + $0x70] sm:$0xff]  }
 0x174   :  { %1152 = vmatprep.subr.bf16.mxu1 %v2042_v6  ;;  %1193 = vmatprep.subr.bf16.mxu0 %v2044_v7  ;;  %v2291_v6 = vld [vmem:[#allocation8 + $0xf0] sm:$0xff]  }
 0x175   :  { %v2292_v7 = vld [vmem:[#allocation8 + $0x30] sm:$0xff]  }
 0x177   :  { %1153 = vmatpush1.bf16.msra.mxu1 %v2041_v12  ;;  %1194 = vmatpush1.bf16.msra.mxu0 %v2043_v13  ;;  %v2297_v12 = vld [vmem:[#allocation8 + $0xb8] sm:$0xff]   ;;  %v2298_v13 = vld [vmem:[#allocation8 + $0x140] sm:$0xff]  }
 0x178   :  { %1154 = vmatprep.subr.bf16.mxu1 %v2050_v14  ;;  %1195 = vmatprep.subr.bf16.mxu0 %v2052_v15  ;;  %v2299_v14 = vld [vmem:[#allocation8 + $0x1c0] sm:$0xff]   ;;  %v378_v15 = vsub.s32 2, %v2548_v28 }
 0x17a   :  { %v379_v19 = vrot.slane %v2569_v16, %v378_v15  ;;  %v390_v15 = vsub.s32 5, %v2548_v28 }
 0x17b   :  { %1155 = vmatpush1.bf16.msra.mxu1 %v2049_v20  ;;  %1196 = vmatpush1.bf16.msra.mxu0 %v2051_v21  ;;  %v375_v20 = vrot.slane %v2569_v16, %v107_v31  ;;  %v383_v21 = vrot.slane %v2569_v16, %v382_v17  ;;  %v398_v17 = vsub.s32 7, %v2548_v28 }
 0x17c   :  { %1156 = vmatprep.subr.bf16.mxu1 %v2058_v22  ;;  %1197 = vmatprep.subr.bf16.mxu0 %v2060_v23 }
 0x17f   :  { %1157 = vmatpush1.bf16.msra.mxu1 %v2057_v30  ;;  %1198 = vmatpush1.bf16.msra.mxu0 %v2059_v32 }
 0x180   :  { %1158 = vmatprep.subr.bf16.mxu1 %v2066_v33  ;;  %1199 = vmatprep.subr.bf16.mxu0 %v2068_v34 }
 0x183   :  { %1159 = vmatpush1.bf16.msra.mxu1 %v2065_v39  ;;  %1200 = vmatpush1.bf16.msra.mxu0 %v2067_v40 }
 0x184   :  { %1160 = vmatprep.subr.bf16.mxu1 %v2074_v41  ;;  %1201 = vmatprep.subr.bf16.mxu0 %v2076_v42 }
 0x187   :  { %1161 = vmatpush1.bf16.msra.mxu1 %v2073_v43  ;;  %1202 = vmatpush1.bf16.msra.mxu0 %v2075_v44 }
 0x188   :  { %2142 = vmatprep.subr.bf16.mxu1 %v2266_v45  ;;  %2164 = vmatprep.subr.bf16.mxu0 %v2267_v46  ;;  %v2300_v45 = vld [vmem:[#allocation8 + $0x100] sm:$0xff]  }
 0x189   :  { %v2301_v46 = vld [vmem:[#allocation8 + $0x180] sm:$0xff]  }
 0x18a   :  { %1163 = vmatmul.mubr.bf16.vlgmr.msra.gmra.mrb[4].mxu1 %v2559_v49  ;;  %1204 = vmatmul.mubr.bf16.vlgmr.msra.gmra.mrb[8].mxu0 %v2559_v49  ;;  %v2281_v49 = vld [vmem:[#allocation8 + $0x98] sm:$0xff]  }
 0x18b   :  { %2143 = vmatpush3.bf16.msra.mxu1 %v2268_v47  ;;  %2165 = vmatpush3.bf16.msra.mxu0 %v2269_v48 }
 0x18c   :  { %2144 = vmatprep.subr.bf16.mxu1 %v2270_v50  ;;  %2166 = vmatprep.subr.bf16.mxu0 %v2271_v51  ;;  %v2302_v50 = vld [vmem:[#allocation8 + $0x148] sm:$0xff]  }
 0x18d   :  { %v2303_v51 = vld [vmem:[#allocation8 + $0x1c8] sm:$0xff]  }
 0x18f   :  { %2145 = vmatpush3.bf16.msra.mxu1 %v2272_v52  ;;  %2167 = vmatpush3.bf16.msra.mxu0 %v2273_v53  ;;  %v2304_v52 = vld [vmem:[#allocation8 + $0x108] sm:$0xff]  }
 0x190   :  { %2146 = vmatprep.subr.bf16.mxu1 %v2274_v54  ;;  %2168 = vmatprep.subr.bf16.mxu0 %v2275_v55  ;;  %v2305_v53 = vld [vmem:[#allocation8 + $0x188] sm:$0xff]   ;;  %v2306_v54 = vld [vmem:[#allocation8 + $0x150] sm:$0xff]  }
 0x191   :  { %v2307_v55 = vld [vmem:[#allocation8 + $0x1d0] sm:$0xff]  }
 0x193   :  { %2147 = vmatpush3.bf16.msra.mxu1 %v2276_v56  ;;  %2169 = vmatpush3.bf16.msra.mxu0 %v2277_v57  ;;  %v2308_v56 = vld [vmem:[#allocation8 + $0x110] sm:$0xff]  }
 0x194   :  { %2148 = vmatprep.subr.bf16.mxu1 %v2278_v58  ;;  %2170 = vmatprep.subr.bf16.mxu0 %v2279_v59  ;;  %v2309_v57 = vld [vmem:[#allocation8 + $0x190] sm:$0xff]   ;;  %v2310_v58 = vld [vmem:[#allocation8 + $0x158] sm:$0xff]  }
 0x195   :  { %v2311_v59 = vld [vmem:[#allocation8 + $0x1d8] sm:$0xff]  }
 0x197   :  { %2149 = vmatpush3.bf16.msra.mxu1 %v2280_v60  ;;  %2171 = vmatpush3.bf16.msra.mxu0 %v2281_v49  ;;  %v2312_v60 = vld [vmem:[#allocation8 + $0x118] sm:$0xff]  }
 0x198   :  { %2150 = vmatprep.subr.bf16.mxu1 %v2282_v61  ;;  %2172 = vmatprep.subr.bf16.mxu0 %v2283_v62  ;;  %v2313_v49 = vld [vmem:[#allocation8 + $0x198] sm:$0xff]   ;;  %v2314_v61 = vld [vmem:[#allocation8 + $0x160] sm:$0xff]  }
 0x199   :  { %v2315_v62 = vld [vmem:[#allocation8 + $0x1e0] sm:$0xff]  }
 0x19b   :  { %2151 = vmatpush3.bf16.msra.mxu1 %v2284_v63  ;;  %2173 = vmatpush3.bf16.msra.mxu0 %v2285_v0  ;;  %v2316_v63 = vld [vmem:[#allocation8 + $0x120] sm:$0xff]  }
 0x19c   :  { %2152 = vmatprep.subr.bf16.mxu1 %v2286_v1  ;;  %2174 = vmatprep.subr.bf16.mxu0 %v2287_v2  ;;  %v2317_v0 = vld [vmem:[#allocation8 + $0x1a0] sm:$0xff]   ;;  %v2318_v1 = vld [vmem:[#allocation8 + $0x168] sm:$0xff]  }
 0x19d   :  { %v2319_v2 = vld [vmem:[#allocation8 + $0x1e8] sm:$0xff]  }
 0x19f   :  { %2153 = vmatpush3.bf16.msra.mxu1 %v2288_v3  ;;  %2175 = vmatpush3.bf16.msra.mxu0 %v2289_v4  ;;  %v2320_v3 = vld [vmem:[#allocation8 + $0x128] sm:$0xff]  }
 0x1a0   :  { %2154 = vmatprep.subr.bf16.mxu1 %v2290_v5  ;;  %2176 = vmatprep.subr.bf16.mxu0 %v2291_v6  ;;  %v2321_v4 = vld [vmem:[#allocation8 + $0x1a8] sm:$0xff]   ;;  %v2322_v5 = vld [vmem:[#allocation8 + $0x170] sm:$0xff]  }
 0x1a1   :  { %v2323_v6 = vld [vmem:[#allocation8 + $0x1f0] sm:$0xff]  }
 0x1a3   :  { %2155 = vmatpush3.bf16.msra.mxu1 %v2292_v7  ;;  %2177 = vmatpush3.bf16.msra.mxu0 %v2293_v8  ;;  %v2324_v7 = vld [vmem:[#allocation8 + $0x130] sm:$0xff]  }
 0x1a4   :  { %2156 = vmatprep.subr.bf16.mxu1 %v2294_v9  ;;  %2178 = vmatprep.subr.bf16.mxu0 %v2295_v10  ;;  %v2325_v8 = vld [vmem:[#allocation8 + $0x1b0] sm:$0xff]   ;;  %v2326_v9 = vld [vmem:[#allocation8 + $0x178] sm:$0xff]  }
 0x1a5   :  { %v2327_v10 = vld [vmem:[#allocation8 + $0x1f8] sm:$0xff]  }
 0x1a7   :  { %2157 = vmatpush3.bf16.msra.mxu1 %v2296_v11  ;;  %2179 = vmatpush3.bf16.msra.mxu0 %v2297_v12  ;;  %v2328_v11 = vld [vmem:[#allocation8 + $0x138] sm:$0xff]  }
 0x1a8   :  { %2186 = vmatprep.subr.bf16.mxu1 %v2298_v13  ;;  %2208 = vmatprep.subr.bf16.mxu0 %v2299_v14  ;;  %v2329_v12 = vld [vmem:[#allocation8 + $0x1b8] sm:$0xff]   ;;  %v386_v13 = vsub.s32 4, %v2548_v28  ;;  %v394_v14 = vsub.s32 6, %v2548_v28 }
 0x21d   :  { %v1082_v22 = vpop.f32.mrb[0].mxu1  ;;  %v1123_v23 = vpop.f32.mrb[4].mxu0 }
 0x21e   :  { %v1083_v24 = vadd.f32 %v1082_v22, %v371_v18  ;;  %v1124_v25 = vadd.f32 %v1123_v23, %v379_v19  ;;  %v1084_v26 = vpop.f32.mrb[1].mxu1  ;;  %v1125_v27 = vpop.f32.mrb[5].mxu0  ;;  %v387_v18 = vrot.slane %v2569_v16, %v386_v13  ;;  %v395_v19 = vrot.slane %v2569_v16, %v394_v14 }
 0x21f   :  { %v1085_v30 = vadd.f32 %v1084_v26, %v375_v20  ;;  %v1126_v32 = vadd.f32 %v1125_v27, %v383_v21  ;;  %v1086_v33 = vpop.f32.mrb[2].mxu1  ;;  %v1127_v34 = vpop.f32.mrb[6].mxu0  ;;  %v391_v20 = vrot.slane %v2569_v16, %v390_v15  ;;  %v399_v21 = vrot.slane %v2569_v16, %v398_v17 }
 0x220   :  { %v1212_v35 = vmul.f32 0.01, %v1083_v24  ;;  %v1214_v29 = vmul.f32 0.01, %v1124_v25  ;;  %v1087_v36 = vpop.f32.mrb[3].mxu1  ;;  %v1128_v37 = vpop.f32.mrb[7].mxu0 }
 0x221   :  { %v1213_v38 = vmul.f32 0.01, %v1085_v30  ;;  %v1215_v39 = vmul.f32 0.01, %v1126_v32 }
 0x222   :  { %v1220_v40 = vmax.f32 %v1083_v24, %v1212_v35  ;;  %v1222_v31 = vmax.f32 %v1124_v25, %v1214_v29 }
 0x223   :  { %v1221_v41 = vmax.f32 %v1085_v30, %v1213_v38  ;;  %v1223_v42 = vmax.f32 %v1126_v32, %v1215_v39 }
 0x224   :  { %v1228_v47 = vpack.c.bf16 %v1220_v40, %v1220_v40  ;;  %v1230_v48 = vpack.c.bf16 %v1222_v31, %v1222_v31 }
 0x225   :  { %v1229_v43 = vpack.c.bf16 %v1221_v41, %v1221_v41  ;;  %v1231_v44 = vpack.c.bf16 %v1223_v42, %v1223_v42 }
 0x227   :  { %1787 = vmatprep.mubr.bf16.mxu1 %v1229_v43  ;;  %1827 = vmatprep.mubr.bf16.mxu0 %v1231_v44 }
 0x228   :  { %1788 = vmatmul.mubr.bf16.vlgmr.msra.gmra.mrb[8].mxu1 %v1228_v47  ;;  %1828 = vmatmul.mubr.bf16.vlgmr.msra.gmra.mrb[12].mxu0 %v1230_v48  ;;  %v2077_v47 = vld [vmem:[%s2609_s6] ss:$0 sm:$0xff]  ;;  %s2459_s6 = smov [#allocation10]  }
 0x229   :  { %2187 = vmatpush3.bf16.msra.mxu1 %v2300_v45  ;;  %2209 = vmatpush3.bf16.msra.mxu0 %v2301_v46  ;;  %s1922_s8 = sshll.u32 %s2459_s6, 4  ;;  %s1923_s8 = int_to_ptr.vmem [resolvable:$true] %s1922_s8 }
 0x22a   :  { %2188 = vmatprep.subr.bf16.mxu1 %v2302_v50  ;;  %2210 = vmatprep.subr.bf16.mxu0 %v2303_v51  ;;  %s2418_s9 = scalar_lea.vmem %s1923_s8, 128  ;;  %p2423_p5 = scmp.lt.s32.totalorder %s1923_s8, %s1923_s8 }
 0x22b   :  { %p2419_p4 = scmp.ne.s32.totalorder %s1923_s8, %s2418_s9  ;;  %p2424_p6 = scmp.lt.s32.totalorder %s2418_s9, %s2418_s9 }
 0x22d   :  { %2189 = vmatpush3.bf16.msra.mxu1 %v2304_v52  ;;  %2211 = vmatpush3.bf16.msra.mxu0 %v2305_v53  ;;  %p2425_p7 = por %p2424_p6, %p2423_p5 }
 0x22e   :  { %2190 = vmatprep.subr.bf16.mxu1 %v2306_v54  ;;  %2212 = vmatprep.subr.bf16.mxu0 %v2307_v55 }
 0x22f   :  { %p2426_p8 = pnand %p2425_p7, %p2419_p4 }
 0x231   :  { %2191 = vmatpush3.bf16.msra.mxu1 %v2308_v56  ;;  %2213 = vmatpush3.bf16.msra.mxu0 %v2309_v57 }
 0x232   :  { %2192 = vmatprep.subr.bf16.mxu1 %v2310_v58  ;;  %2214 = vmatprep.subr.bf16.mxu0 %v2311_v59 }
 0x235   :  { %2193 = vmatpush3.bf16.msra.mxu1 %v2312_v60  ;;  %2215 = vmatpush3.bf16.msra.mxu0 %v2313_v49 }
 0x236   :  { %2194 = vmatprep.subr.bf16.mxu1 %v2314_v61  ;;  %2216 = vmatprep.subr.bf16.mxu0 %v2315_v62 }
 0x239   :  { %2195 = vmatpush3.bf16.msra.mxu1 %v2316_v63  ;;  %2217 = vmatpush3.bf16.msra.mxu0 %v2317_v0 }
 0x23a   :  { %2196 = vmatprep.subr.bf16.mxu1 %v2318_v1  ;;  %2218 = vmatprep.subr.bf16.mxu0 %v2319_v2 }
 0x23d   :  { %2197 = vmatpush3.bf16.msra.mxu1 %v2320_v3  ;;  %2219 = vmatpush3.bf16.msra.mxu0 %v2321_v4 }
 0x23e   :  { %2198 = vmatprep.subr.bf16.mxu1 %v2322_v5  ;;  %2220 = vmatprep.subr.bf16.mxu0 %v2323_v6 }
 0x241   :  { %2199 = vmatpush3.bf16.msra.mxu1 %v2324_v7  ;;  %2221 = vmatpush3.bf16.msra.mxu0 %v2325_v8 }
 0x242   :  { %2200 = vmatprep.subr.bf16.mxu1 %v2326_v9  ;;  %2222 = vmatprep.subr.bf16.mxu0 %v2327_v10 }
 0x245   :  { %2201 = vmatpush3.bf16.msra.mxu1 %v2328_v11  ;;  %2223 = vmatpush3.bf16.msra.mxu0 %v2329_v12 }
 0x25d   :  { %v1164_v22 = vpop.f32.mrb[4].mxu1  ;;  %v1205_v23 = vpop.f32.mrb[8].mxu0 }
 0x25e   :  { %v1165_v24 = vadd.f32 %v1164_v22, %v387_v18  ;;  %v1206_v25 = vadd.f32 %v1205_v23, %v395_v19  ;;  %v1166_v26 = vpop.f32.mrb[5].mxu1  ;;  %v1207_v27 = vpop.f32.mrb[9].mxu0 }
 0x25f   :  { %v1167_v30 = vadd.f32 %v1166_v26, %v391_v20  ;;  %v1208_v32 = vadd.f32 %v1207_v27, %v399_v21  ;;  %v1168_v33 = vpop.f32.mrb[6].mxu1  ;;  %v1209_v34 = vpop.f32.mrb[10].mxu0 }
 0x260   :  { %v1216_v35 = vmul.f32 0.01, %v1165_v24  ;;  %v1218_v28 = vmul.f32 0.01, %v1206_v25  ;;  %v1169_v29 = vpop.f32.mrb[7].mxu1  ;;  %v1210_v36 = vpop.f32.mrb[11].mxu0 }
 0x261   :  { %v1217_v37 = vmul.f32 0.01, %v1167_v30  ;;  %v1219_v38 = vmul.f32 0.01, %v1208_v32 }
 0x262   :  { %v1224_v39 = vmax.f32 %v1165_v24, %v1216_v35  ;;  %v1226_v40 = vmax.f32 %v1206_v25, %v1218_v28 }
 0x263   :  { %v1225_v31 = vmax.f32 %v1167_v30, %v1217_v37  ;;  %v1227_v16 = vmax.f32 %v1208_v32, %v1219_v38 }
 0x264   :  { %v1232_v43 = vpack.c.bf16 %v1224_v39, %v1224_v39  ;;  %v1234_v44 = vpack.c.bf16 %v1226_v40, %v1226_v40 }
 0x265   :  { %v1233_v41 = vpack.c.bf16 %v1225_v31, %v1225_v31  ;;  %v1235_v42 = vpack.c.bf16 %v1227_v16, %v1227_v16 }
 0x267   :  { %1867 = vmatprep.mubr.bf16.mxu1 %v1233_v41  ;;  %1907 = vmatprep.mubr.bf16.mxu0 %v1235_v42 }
 0x268   :  { %1868 = vmatmul.mubr.bf16.vlgmr.msra.gmra.mrb[12].mxu1 %v1232_v43  ;;  %1908 = vmatmul.mubr.bf16.vlgmr.msra.gmra.mrb[16].mxu0 %v1234_v44 }
 0x2fb   :  { %v2158_v45 = vpop.f32.mrb[8].mxu1  ;;  %v2180_v46 = vpop.f32.mrb[12].mxu0 }
 0x2fc   :  { %v2159_v48 = vpop.f32.mrb[9].mxu1  ;;  %v2181_v50 = vpop.f32.mrb[13].mxu0 }
 0x2fd   :  { %v2160_v51 = vadd.f32 %v2159_v48, %v2158_v45  ;;  %v2182_v52 = vadd.f32 %v2181_v50, %v2180_v46  ;;  %v2161_v53 = vpop.f32.mrb[10].mxu1  ;;  %v2183_v54 = vpop.f32.mrb[14].mxu0 }
 0x2fe   :  { %v2162_v55 = vpop.f32.mrb[11].mxu1  ;;  %v2184_v56 = vpop.f32.mrb[15].mxu0 }
 0x2ff   :  { %v1790_v57 = vadd.f32 %v2160_v51, %v2077_v47 }
 0x301   :  { %v1830_v58 = vadd.f32 %v2182_v52, %v1790_v57 }
 0x33b   :  { %v2202_v59 = vpop.f32.mrb[12].mxu1  ;;  %v2224_v60 = vpop.f32.mrb[16].mxu0 }
 0x33c   :  { %v2203_v49 = vpop.f32.mrb[13].mxu1  ;;  %v2225_v61 = vpop.f32.mrb[17].mxu0 }
 0x33d   :  { %v2204_v62 = vadd.f32 %v2203_v49, %v2202_v59  ;;  %v2226_v63 = vadd.f32 %v2225_v61, %v2224_v60  ;;  %v2205_v0 = vpop.f32.mrb[14].mxu1  ;;  %v2227_v1 = vpop.f32.mrb[18].mxu0 }
 0x33e   :  { %v2206_v2 = vpop.f32.mrb[15].mxu1  ;;  %v2228_v3 = vpop.f32.mrb[19].mxu0 }
 0x33f   :  { %v1870_v4 = vadd.f32 %v2204_v62, %v1830_v58 }
 0x341   :  { %v1910_v5 = vadd.f32 %v2226_v63, %v1870_v4 }
 0x343   :  { %1915 = vst [vmem:[#allocation10] sm:$0xff] %v1910_v5 }
 0x344   :  { %2429 = shalt.err (!%p2426_p8)
}
 0x345   :  { %s2430_s12 = scalar_lea.hbm %s2610_s7, 128 }
 0x346   :  { %p2431_p9 = scmp.ne.s32.totalorder %s2610_s7, %s2430_s12  ;;  %p2434_p10 = scmp.lt.u32.totalorder %s2430_s12, %s2610_s7 }
 0x348   :  { %p2436_p11 = pnand %p2434_p10, %p2431_p9 }
 0x34a   :  { %2439 = shalt.err (!%p2436_p11)
}
 0x34b   :  { %1925 = dma.vmem_to_hbm [thread:$0]  %s1923_s8, 128, %s2610_s7, [#allocation4]  }
 0x34c   :  { %2446 = dma.done.wait [#allocation4], 128  }
 0x34d   :  { %2447 = vsyncadd [#allocation4], 4294967168 }
 0x34e   :  { %1929 = vsyncpa [#allocation3], 1 }
 0x34f   :  { %1930 = vsyncpa [#allocation6], 1 }
 0x350   :  { %1931 = vsyncpa [#allocation9], 1 }
 0x351   :  { %1932 = vsyncpa [#allocation4], 1 }

</bundles_post_ra>
